<compile_context>
chip_gen: v6e
topology: v6e:2x2x1
jax: 0.10.0
libtpu: 0.0.40
codegen_flags: <defaults>
</compile_context>

<pallas_src>
import jax
import jax.numpy as jnp
from jax.experimental import pallas as pl
from jax.experimental.pallas import tpu as pltpu

_LANES = 128
_TILE_BYTES = 2 * 1024 * 1024  # 2 MiB per input tile -> <= 8 MiB double-buffered


def _sublane(dtype) -> int:
    # Minimum sublane tile per dtype: 32-bit -> 8, 16-bit -> 16, 8-bit -> 32.
    itemsize = jnp.dtype(dtype).itemsize
    return max(8, 32 // max(itemsize, 1))


def _round_up(a: int, b: int) -> int:
    return ((a + b - 1) // b) * b


def _swish_kernel(x_ref, o_ref):
    x = x_ref[...].astype(jnp.float32)
    # sigmoid(x) = 0.5 * (tanh(x/2) + 1): single EUP op, no VALU divide,
    # and well-defined for +/-inf inputs.
    sig = jnp.tanh(x * 0.5) * 0.5 + 0.5
    o_ref[...] = (x * sig).astype(o_ref.dtype)


def _pick_block_rows(rows: int, dtype) -> int:
    sub = _sublane(dtype)
    itemsize = jnp.dtype(dtype).itemsize
    max_rows = max(sub, _TILE_BYTES // (_LANES * itemsize))   # 4096 rows for f32
    # Aim for >= 2 grid steps whenever the input spans more than one minimum
    # tile (v7x megacore); collapses naturally to a single step for tiny inputs.
    half = _round_up(-(-rows // 2), sub)
    return max(sub, min(max_rows, half))


def _run_2d(x2, block_rows: int):
    rows, lanes = x2.shape
    grid = (pl.cdiv(rows, block_rows),)
    return pl.pallas_call(
        _swish_kernel,
        out_shape=jax.ShapeDtypeStruct((rows, lanes), x2.dtype),
        grid=grid,
        in_specs=[pl.BlockSpec((block_rows, lanes), lambda i: (i, 0))],
        out_specs=pl.BlockSpec((block_rows, lanes), lambda i: (i, 0)),
        compiler_params=pltpu.CompilerParams(
            dimension_semantics=("parallel",)),
    )(x2)


def swish(x):
    """Swish / SiLU: x * sigmoid(x), for an arbitrary-shaped array."""
    orig_shape = x.shape
    dtype = x.dtype
    n = int(x.size)
    if n == 0:
        return x
    sub = _sublane(dtype)
    rows = -(-n // _LANES)
    xf = jnp.ravel(x)

    if n % (_LANES * sub) == 0:
        # Fast path: flat size already (sublane x lane) aligned -> free
        # reshape, no pad, no post-kernel slice.
        x2 = xf.reshape(rows, _LANES)
        out2 = _run_2d(x2, _pick_block_rows(rows, dtype))
        return out2.reshape(orig_shape)

    # Slow path: pad only to the (sublane, 128) tile boundary; the ragged last
    # grid block (if any) is handled by Pallas — edge writes past the array
    # are dropped, so correctness is unchanged.
    rows_p = _round_up(rows, sub)
    xf = jnp.pad(xf, (0, rows_p * _LANES - n))
    x2 = xf.reshape(rows_p, _LANES)
    out2 = _run_2d(x2, _pick_block_rows(rows_p, dtype))
    return out2.reshape(-1)[:n].reshape(orig_shape)


if __name__ == "__main__":
    key = jax.random.PRNGKey(0)
    # Small 4-D input (batch=2, channels=4, 16x16 spatial) — hits the aligned
    # fast path (2048 elems = 16 rows x 128 lanes), grid of 2 parallel steps.
    x = jax.random.normal(key, (2, 4, 16, 16), jnp.float32)
    y = swish(x)
    jax.block_until_ready(y)
    y_ref = x * jax.nn.sigmoid(x)
    assert y.shape == x.shape
    assert bool(jnp.all(jnp.isfinite(y)))
    assert bool(jnp.allclose(y, y_ref, atol=1e-5, rtol=1e-5))

    # Also exercise the padded (unaligned) path on an odd shape.
    x_odd = jax.random.normal(jax.random.PRNGKey(1), (3, 7, 5), jnp.float32)
    y_odd = swish(x_odd)
    jax.block_until_ready(y_odd)
    assert y_odd.shape == x_odd.shape
    assert bool(jnp.allclose(y_odd, x_odd * jax.nn.sigmoid(x_odd),
                             atol=1e-5, rtol=1e-5))

    print("KERNEL_OK")
</pallas_src>

<mosaic_0001>
module attributes {stable_mosaic.version = 11 : i64} {
  func.func @_swish_kernel(%arg0: i32, %arg1: memref<8x128xf32, #tpu.memory_space<vmem>>, %arg2: memref<8x128xf32, #tpu.memory_space<vmem>>) attributes {dimension_semantics = [#tpu.dimension_semantics<parallel>], iteration_bounds = array<i64: 2>, scalar_prefetch = 0 : i64, scratch_operands = 0 : i64, tpu.core_type = #tpu.core_type<tc>, window_params = [{transform_indices = @transform_0, window_bounds = array<i64: 8, 128>}, {transform_indices = @transform_1, window_bounds = array<i64: 8, 128>}]} {
    %c0 = arith.constant 0 : index
    %c0_0 = arith.constant 0 : index
    %0 = vector.load %arg1[%c0, %c0_0] : memref<8x128xf32, #tpu.memory_space<vmem>>, vector<8x128xf32>
    %cst = arith.constant 5.000000e-01 : f32
    %1 = vector.broadcast %cst : f32 to vector<8x128xf32>
    %2 = arith.mulf %0, %1 : vector<8x128xf32>
    %3 = math.tanh %2 : vector<8x128xf32>
    %cst_1 = arith.constant 5.000000e-01 : f32
    %4 = vector.broadcast %cst_1 : f32 to vector<8x128xf32>
    %5 = arith.mulf %3, %4 : vector<8x128xf32>
    %cst_2 = arith.constant 5.000000e-01 : f32
    %6 = vector.broadcast %cst_2 : f32 to vector<8x128xf32>
    %7 = arith.addf %5, %6 : vector<8x128xf32>
    %8 = arith.mulf %0, %7 : vector<8x128xf32>
    %c0_3 = arith.constant 0 : index
    %c0_4 = arith.constant 0 : index
    %9 = vector.load %arg2[%c0_3, %c0_4] : memref<8x128xf32, #tpu.memory_space<vmem>>, vector<8x128xf32>
    tpu.vector_store %arg2[%c0_3, %c0_4], %8 {strides = array<i32>} : memref<8x128xf32, #tpu.memory_space<vmem>>, vector<8x128xf32>,
    return
  }
  func.func @transform_0(%arg0: i32) -> (i32, i32) {
    %c0_i32 = arith.constant 0 : i32
    %c0_i32_0 = arith.constant 0 : i32
    return %arg0, %c0_i32 : i32, i32
  }
  func.func @transform_1(%arg0: i32) -> (i32, i32) {
    %c0_i32 = arith.constant 0 : i32
    %c0_i32_0 = arith.constant 0 : i32
    return %arg0, %c0_i32 : i32, i32
  }
}

</mosaic_0001>

<bundles_post_ra>
// kernel: tpu_custom_call.1
= control target key start
LH: loop header
LB: loop body
LE: loop exit
PB: predicated region body
PF: predicated region fallthrough
CT: control target
= control target key end

     0   :  { %6 = vsyncpa [#allocation3], 0  ;;  %s530_s0 = inlined_call_operand.hbm [shape: f32[16,128], index: 0, kind: input, shape index: {}]   ;;  %s531_s1 = inlined_call_operand.hbm [shape: f32[16,128], index: 1, kind: output, shape index: {}]  }
   0x1   :  { %8 = vsyncpa [#allocation3 + $0x1], 0 }
   0x2   :  { %9 = vsyncpa [#allocation4], 0 }
   0x3   :  { %11 = vsyncpa [#allocation4 + $0x1], 0  ;;  %s389_s6 = smov 0   ;;  %s391_s7 = smov 0  }
   0x4   :  { %s393_s8 = smov 0   ;;  %s395_s9 = smov 0  }
   0x5 LB: > { %s410_s10 = sadd.s32 4294967295, %s375_s9   ;;  %s223_s11 = sadd.s32 4294967294, %s375_s9   ;;  %s375_s9 = sphi %s395_s9, %s548_s9   ;;  %s371_s8 = sphi %s393_s8, %s547_s8   ;;  %s367_s7 = sphi %s391_s7, %s546_s7   ;;  %s363_s6 = sphi %s389_s6, %s545_s6  }
   0x6   : > { %s414_s12 = sadd.s32 1, %s375_s9   ;;  %s24_s13 = sadd.s32 1, %s371_s8 }
   0x7   : > { %s21_s14 = ssub.s32 %s375_s9, %s414_s12  ;;  %p31_p0 = scmp.ne.s32.totalorder %s371_s8, %s367_s7 }
   0x8   : > { %p22_p1 = scmp.eq.s32.totalorder %s21_s14, 0  ;;  %p32_p2 = scmp.eq.s32.totalorder %s375_s9, 0 }
   0x9   : > { %p37_p3 = scmp.ne.s32.totalorder %s367_s7, %s363_s6  ;;  %p38_p4 = scmp.eq.s32.totalorder %s410_s10, 0 }
   0xa   : > { %s426_s15 = scalar_select %p22_p1, %s371_s8, %s24_s13  }
   0xb   : > { %p428_p5 = por %p32_p2, %p31_p0  ;;  %p432_p6 = por %p38_p4, %p37_p3 }
   0xc   : > { %p61_p7 = scmp.eq.s32.totalorder %s410_s10, 1  ;;  %p67_p8 = scmp.eq.s32.totalorder %s223_s11, 1 }
   0xd   : > { %s535_s17 = scalar_select %p432_p6, 1, 0 }
   0xe   : > { %p247_p10 = scmp.lt.s32.totalorder %s375_s9, 2  ;;  %p439_p11 = por %p61_p7, %p31_p0 }
   0xf   : > { %p443_p12 = por %p67_p8, %p37_p3  ;;  %s87_s20 = sand.u32 1, %s371_s8  }
  0x10   : > { %s536_s18 = scalar_select %p439_p11, 1, 0 }
  0x11   : > { %s537_s19 = scalar_select %p443_p12, 1, 0 }
  0x12   : > { %s227_s21 = sshll.u32 %s375_s9, 7  ;;  %s226_s22 = sshll.u32 %s87_s20, 3 }
  0x13   : > { %s452_s25 = scalar_lea.hbm %s530_s0, %s227_s21  ;;  %s91_s26 = scalar_lea.vmem [#allocation2], %s226_s22 }
  0x14   : > { %s98_s27 = sshll.u32 %s91_s26, 4  ;;  %p456_p13 = pnand %p247_p10, %p428_p5  ;;  %s460_s27 = int_to_ptr.vmem [resolvable:$true] %s98_s27 }
  0x15   : > { %s88_s29 = scalar_lea.sflag [#allocation3], %s87_s20  ;;  %s283_s30 = scalar_lea.hbm %s452_s25, 128 }
  0x16   : > { %p284_p2 = scmp.ne.s32.totalorder %s452_s25, %s283_s30  ;;  %p285_p3 = pneg %p456_p13 }
  0x17   : > { %s288_s4 = scalar_lea.hbm %s530_s0, 256  ;;  %p289_p5 = scmp.lt.s32.totalorder %s452_s25, %s530_s0 }
  0x18   : > { %p286_p4 = pnand %p285_p3, %p284_p2  ;;  %p290_p8 = scmp.lt.s32.totalorder %s288_s4, %s283_s30 }
  0x1a   : > { %p287_p7 = pneg %p286_p4  ;;  %p291_p10 = por %p290_p8, %p289_p5 }
  0x1c   : > { %p292_p9 = pnand %p291_p10, %p287_p7 }
  0x1e   : > { %295 = shalt.err (!%p292_p9)
}
  0x1f   : > { %s296_s13 = scalar_lea.vmem %s460_s27, 128  ;;  %s377_s14 = smov [#allocation2]  }
  0x20   : > { %p297_p0 = scmp.ne.s32.totalorder %s460_s27, %s296_s13  ;;  %s301_s16 = sshll.u32 %s377_s14, 4  ;;  %s302_s16 = int_to_ptr.vmem [resolvable:$false] %s301_s16 }
  0x21   : > { %s303_s20 = scalar_lea.vmem %s302_s16, 256  ;;  %p304_p4 = scmp.lt.s32.totalorder %s460_s27, %s302_s16 }
  0x22   : > { %p299_p1 = pnand %p297_p0, %p285_p3  ;;  %p305_p12 = scmp.lt.s32.totalorder %s303_s20, %s296_s13 }
  0x24   : > { %p300_p2 = pneg %p299_p1  ;;  %p306_p11 = por %p305_p12, %p304_p4 }
  0x26   : > { %p307_p6 = pnand %p306_p11, %p300_p2 }
  0x28   : > { %310 = shalt.err (!%p307_p6)
}
  0x29   : > { %242 = dma.hbm_to_vmem [thread:$0]  (!%p456_p13), %s452_s25, 128, %s460_s27, %s88_s29  }
  0x2a   : > { %p539_p9 = scmp.lt.s32.totalorder %s375_s9, 3  ;;  %p540_p7 = scmp.ge.s32.totalorder %s375_s9, 1 }
  0x2c   : > { %p104_p0 = pnand %p540_p7, %p539_p9 }
  0x2d   : > { %s487_s21 = sand.u32 (!%p104_p0), 1, %s367_s7   ;;  %p541_p6 = scmp.ne.s32.totalorder (!%p104_p0), %s535_s17, 0 }
  0x2e   : > { %107 = sbr.rel (%p104_p0) target bundleno = 88 (0x58), region = 24  ;;  %s229_s22 = sshll.u32 (!%p104_p0), %s487_s21, 3 }
  0x2f   : > { %s110_s23 = scalar_lea.sflag (!%p104_p0), [#allocation3], %s487_s21  ;;  %s113_s24 = scalar_lea.vmem (!%p104_p0), [#allocation2], %s229_s22 }
  0x33   : > { %354 = dma.done.wait (%p541_p6), %s110_s23, 128  }
  0x34   : > { %356 = vsyncadd (%p541_p6), %s110_s23, 4294967168  ;;  %v132_v0 = vld [vmem:[%s113_s24] sm:$0xff]  ;;  %s131_s25 = scalar_lea.vmem [#allocation5], %s229_s22  ;;  %s232_s27 = sshll.u32 %s410_s10, 7 }
  0x35   : > { %v133_v1 = vmul.f32 0.5, %v132_v0  ;;  %s153_s26 = sshll.u32 %s131_s25, 4  ;;  %s151_s30 = scalar_lea.hbm %s531_s1, %s232_s27  ;;  %s154_s26 = int_to_ptr.vmem [resolvable:$true] %s153_s26 }
  0x36   : > { %s140_s17 = scalar_lea.sflag [#allocation4], %s487_s21  ;;  %s311_s2 = scalar_lea.vmem %s154_s26, 128 }
  0x37   : > { %281 = vtanh.f32 %v133_v1  ;;  %p312_p11 = scmp.ne.s32.totalorder %s154_s26, %s311_s2  ;;  %p542_p12 = scmp.ne.s32.totalorder %s536_s18, 0 }
  0x38   : > { %s378_s3 = smov [#allocation5]  }
  0x39   : > { %p313_p13 = pnand %p312_p11, %p542_p12  ;;  %s315_s4 = sshll.u32 %s378_s3, 4  ;;  %s316_s4 = int_to_ptr.vmem [resolvable:$false] %s315_s4 }
  0x3a   : > { %s317_s5 = scalar_lea.vmem %s316_s4, 256  ;;  %p318_p3 = scmp.lt.s32.totalorder %s154_s26, %s316_s4 }
  0x3b   : > { %p314_p1 = pneg %p313_p13  ;;  %p319_p5 = scmp.lt.s32.totalorder %s317_s5, %s311_s2 }
  0x3d   : > { %p320_p8 = por %p319_p5, %p318_p3 }
  0x3f   : > { %p321_p10 = pnand %p320_p8, %p314_p1 }
  0x44   : > { %v282_v2 = vpop.eup %281 }
  0x45   : > { %v135_v3 = vmul.f32 0.5, %v282_v2 }
  0x47   : > { %v136_v4 = vadd.f32 0.5, %v135_v3 }
  0x49   : > { %v137_v5 = vmul.f32 %v136_v4, %v132_v0 }
  0x4b   : > { %138 = vst [vmem:[%s131_s25] sm:$0xff] %v137_v5 }
  0x4c   : > { %324 = shalt.err (!%p321_p10)
}
  0x4d   : > { %s325_s10 = scalar_lea.hbm %s151_s30, 128  ;;  %s329_s14 = scalar_lea.hbm %s531_s1, 256 }
  0x4e   : > { %p326_p2 = scmp.ne.s32.totalorder %s151_s30, %s325_s10  ;;  %p330_p7 = scmp.lt.s32.totalorder %s151_s30, %s531_s1 }
  0x4f   : > { %p331_p0 = scmp.lt.s32.totalorder %s329_s14, %s325_s10 }
  0x50   : > { %p327_p4 = pnand %p326_p2, %p542_p12 }
  0x51   : > { %p332_p6 = por %p331_p0, %p330_p7 }
  0x52   : > { %p328_p9 = pneg %p327_p4 }
  0x54   : > { %p333_p11 = pnand %p332_p6, %p328_p9 }
  0x56   : > { %336 = shalt.err (!%p333_p11)
}
  0x57   : > { %237 = dma.vmem_to_hbm [thread:$0]  (%p542_p12), %s154_s26, 128, %s151_s30, %s140_s17  }
  0x58 PF: > { %s165_s21 = sand.u32 1, %s363_s6   ;;  %p543_p13 = scmp.ne.s32.totalorder %s537_s19, 0 }
  0x59   : > { %p544_p1 = scmp.ge.s32.totalorder %s375_s9, 2  ;;  %s166_s22 = scalar_lea.sflag [#allocation4], %s165_s21 }
  0x5b   : > { %p244_p3 = pnand %p544_p1, %p543_p13 }
  0x5d   : > { %p245_p5 = pneg %p244_p3 }
  0x5f   : > { %358 = dma.done.wait (%p245_p5), %s166_s22, 128  }
  0x60   : > { %360 = vsyncadd (%p245_p5), %s166_s22, 4294967168  ;;  %p14_p8 = scmp.ge.s32.totalorder %s414_s12, 4   ;;  %s545_s6 = smov %s367_s7 }
  0x61   : > { %s546_s7 = smov %s371_s8  ;;  %s547_s8 = smov %s426_s15 }
  0x62   : > { %s548_s9 = smov %s414_s12  ;;  %16 = sbr.rel (!%p14_p8) target bundleno = 5 (0x5), region = 69 }
  0x67   :  { %171 = vsyncpa [#allocation3], 1 }
  0x68   :  { %173 = vsyncpa [#allocation3 + $0x1], 1 }
  0x69   :  { %174 = vsyncpa [#allocation4], 1 }
  0x6a   :  { %176 = vsyncpa [#allocation4 + $0x1], 1 }

</bundles_post_ra>
